<compile_context>
chip_gen: v7x
topology: tpu7x:2x2x1
jax: 0.10.0
libtpu: 0.0.40
codegen_flags: <defaults>
</compile_context>

<pallas_src>
import functools

import jax
import jax.numpy as jnp
from jax.experimental import pallas as pl
from jax.experimental.pallas import tpu as pltpu

EPS = 1e-05
MOMENTUM = 0.9


def _batchnorm_kernel(x_ref, log_gamma_ref, beta_ref, y_ref, stats_ref, *, eps):
    # One independent feature tile: (N, TILE_D). Reduction is over axis 0 only,
    # so there is no cross-tile communication. OOB lanes of the last block may
    # hold garbage; their outputs are masked on writeback.
    x = x_ref[...]                                            # (N, TILE_D), input dtype
    n = x.shape[0]

    # Batch statistics (torch .mean(0) / .var(0), unbiased). Mean accumulates
    # in f32 without materializing a full f32 copy of x.
    mean = jnp.sum(x, axis=0, keepdims=True, dtype=jnp.float32) * (1.0 / n)

    # Two-pass unbiased variance; `diff` is the only (N, TILE_D) f32 temporary.
    diff = x.astype(jnp.float32) - mean
    # TODO(synk): n == 1 gives nan (0 * inf) for the unbiased variance, same as torch.
    ddof_scale = (1.0 / (n - 1)) if n > 1 else float("nan")
    var = jnp.sum(diff * diff, axis=0, keepdims=True) * ddof_scale

    inv_std = jax.lax.rsqrt(var + eps)                        # EUP rsqrt
    log_gamma = log_gamma_ref[...].astype(jnp.float32)        # (1, TILE_D)
    beta = beta_ref[...].astype(jnp.float32)                  # (1, TILE_D)

    # Fold the affine into per-feature scale/bias: y = x * scale + bias.
    scale = jnp.exp(log_gamma) * inv_std                      # (1, TILE_D)
    bias = beta - scale * mean                                 # (1, TILE_D)
    y_ref[...] = (x.astype(jnp.float32) * scale + bias).astype(y_ref.dtype)

    # Packed per-feature stats output: row 0 = mean, row 1 = var.
    stats_ref[0:1, :] = mean.astype(stats_ref.dtype)
    stats_ref[1:2, :] = var.astype(stats_ref.dtype)


def _vmem_budget_bytes():
    """Scoped-VMEM budget derived from the chip's physical VMEM capacity."""
    cap = None
    try:
        info = pltpu.get_tpu_info()
        cap = getattr(info, "vmem_capacity_bytes", None)
    except Exception:
        cap = None
    if not cap:
        cap = 64 * 1024 * 1024  # v7x-safe fallback
    # ~75% of physical, capped at 100 MiB (leave headroom for the compiler).
    return int(min(int(cap * 0.75), 100 * 1024 * 1024))


def _choose_tile_d(n, d, itemsize, vmem_budget_bytes, target_block_bytes):
    """Pick a lane-dense (multiple of 128) feature tile.

    Targets ~`target_block_bytes` of x per block for DMA efficiency, capped so
    the whole per-step footprint (double-buffered x and y plus the in-kernel
    f32 diff temp, ~(4*itemsize + 8)*N*tile_d bytes) fits the VMEM budget.
    """
    d_128 = 128 * pl.cdiv(d, 128)
    tile = max(128, (target_block_bytes // max(1, n * itemsize)) // 128 * 128)
    per_lane_bytes = n * (4 * itemsize + 8)
    vmem_cap = max(128, (vmem_budget_bytes // max(1, per_lane_bytes)) // 128 * 128)
    # TODO(synk): if even tile_d=128 exceeds the budget (huge N on v7x), a
    # 2-axis grid with sum/sumsq accumulation over N would be needed instead.
    return int(min(tile, vmem_cap, d_128))


def batchnorm_forward(x, log_gamma, beta, running_mean, running_var,
                      *, momentum=MOMENTUM, eps=EPS, target_block_bytes=2 << 20):
    """Training-mode forward of the RealNVP BatchNorm layer.

    Returns (y, log_abs_det_jacobian broadcast to x.shape, new_running_mean,
    new_running_var).
    """
    n, d = x.shape
    itemsize = jnp.dtype(x.dtype).itemsize

    vmem_budget = _vmem_budget_bytes()
    tile_d = _choose_tile_d(n, d, itemsize, vmem_budget, target_block_bytes)
    n_tiles = pl.cdiv(d, tile_d)
    d_pad = tile_d * n_tiles

    # Only the tiny per-feature parameter vectors are padded; x / y / stats are
    # left at their true D and the last block's OOB lanes are masked by Pallas.
    def pad_vec(a):
        a2 = a.reshape(1, d).astype(jnp.float32)
        if d == d_pad:
            return a2
        return jnp.pad(a2, ((0, 0), (0, d_pad - d)))

    lg2 = pad_vec(log_gamma)
    b2 = pad_vec(beta)

    y, stats = pl.pallas_call(
        functools.partial(_batchnorm_kernel, eps=eps),
        grid=(n_tiles,),
        in_specs=[
            pl.BlockSpec((n, tile_d), lambda j: (0, j)),
            pl.BlockSpec((1, tile_d), lambda j: (0, j)),
            pl.BlockSpec((1, tile_d), lambda j: (0, j)),
        ],
        out_specs=[
            pl.BlockSpec((n, tile_d), lambda j: (0, j)),
            pl.BlockSpec((2, tile_d), lambda j: (0, j)),
        ],
        out_shape=(
            jax.ShapeDtypeStruct((n, d), x.dtype),
            jax.ShapeDtypeStruct((2, d), jnp.float32),
        ),
        compiler_params=pltpu.CompilerParams(
            # TODO(synk): on v7x, verify both TensorCores are used; if not,
            # switch this axis to pltpu.CORE_PARALLEL.
            dimension_semantics=("parallel",),
            vmem_limit_bytes=vmem_budget,
        ),
    )(x, lg2, b2)

    batch_mean = stats[0]                                     # (D,) f32
    batch_var = stats[1]                                      # (D,) f32

    # Module semantics: log_abs_det_jacobian.expand_as(x); computed from the
    # tiny (D,) var output, broadcast lazily (no kernel-side (N, D) write).
    ladj_1d = log_gamma.astype(jnp.float32) - 0.5 * jnp.log(batch_var + eps)
    ladj = jnp.broadcast_to(ladj_1d, (n, d))

    # Buffer side-effect (running-stat EMA), reusing the kernel-computed stats.
    new_rm = running_mean * momentum + batch_mean.astype(running_mean.dtype) * (1.0 - momentum)
    new_rv = running_var * momentum + batch_var.astype(running_var.dtype) * (1.0 - momentum)

    return y, ladj, new_rm, new_rv


if __name__ == "__main__":
    key = jax.random.PRNGKey(0)
    N, D = 8, 32  # small synthetic shapes: batch=8, input_size=32

    x = jax.random.normal(key, (N, D), dtype=jnp.float32)

    # Deterministic parameter init, matching nn.Parameter(torch.zeros(input_size))
    # and the registered buffers.
    log_gamma = jnp.zeros((D,), dtype=jnp.float32)
    beta = jnp.zeros((D,), dtype=jnp.float32)
    running_mean = jnp.zeros((D,), dtype=jnp.float32)
    running_var = jnp.ones((D,), dtype=jnp.float32)

    y, ladj, new_rm, new_rv = batchnorm_forward(
        x, log_gamma, beta, running_mean, running_var
    )
    jax.block_until_ready((y, ladj, new_rm, new_rv))

    # Reference check against pure-JAX math (same semantics as the torch module).
    mean_ref = jnp.mean(x, axis=0)
    var_ref = jnp.var(x, axis=0, ddof=1)
    x_hat_ref = (x - mean_ref) / jnp.sqrt(var_ref + EPS)
    y_ref = jnp.exp(log_gamma) * x_hat_ref + beta
    ladj_ref = jnp.broadcast_to(log_gamma - 0.5 * jnp.log(var_ref + EPS), x.shape)
    new_rm_ref = running_mean * MOMENTUM + mean_ref * (1.0 - MOMENTUM)
    new_rv_ref = running_var * MOMENTUM + var_ref * (1.0 - MOMENTUM)

    assert jnp.allclose(y, y_ref, atol=1e-5, rtol=1e-5)
    assert jnp.allclose(ladj, ladj_ref, atol=1e-5, rtol=1e-5)
    assert jnp.allclose(new_rm, new_rm_ref, atol=1e-6, rtol=1e-6)
    assert jnp.allclose(new_rv, new_rv_ref, atol=1e-6, rtol=1e-6)

    print("KERNEL_OK")
</pallas_src>

<mosaic_0001>
module attributes {stable_mosaic.version = 11 : i64} {
  func.func @_batchnorm_kernel(%arg0: i32, %arg1: memref<8x128xf32, #tpu.memory_space<vmem>>, %arg2: memref<1x128xf32, #tpu.memory_space<vmem>>, %arg3: memref<1x128xf32, #tpu.memory_space<vmem>>, %arg4: memref<8x128xf32, #tpu.memory_space<vmem>>, %arg5: memref<2x128xf32, #tpu.memory_space<vmem>>) attributes {dimension_semantics = [#tpu.dimension_semantics<parallel>], iteration_bounds = array<i64: 1>, scalar_prefetch = 0 : i64, scratch_operands = 0 : i64, tpu.core_type = #tpu.core_type<tc>, window_params = [{transform_indices = @transform_0, window_bounds = array<i64: 8, 128>}, {transform_indices = @transform_1, window_bounds = array<i64: 1, 128>}, {transform_indices = @transform_2, window_bounds = array<i64: 1, 128>}, {transform_indices = @transform_3, window_bounds = array<i64: 8, 128>}, {transform_indices = @transform_4, window_bounds = array<i64: 2, 128>}]} {
    %c0 = arith.constant 0 : index
    %c0_0 = arith.constant 0 : index
    %0 = vector.load %arg1[%c0, %c0_0] : memref<8x128xf32, #tpu.memory_space<vmem>>, vector<8x128xf32>
    %cst = arith.constant dense<0.000000e+00> : vector<128xf32>
    %1 = vector.multi_reduction <add>, %0, %cst [0] : vector<8x128xf32> to vector<128xf32>
    %2 = vector.shape_cast %1 : vector<128xf32> to vector<1x128xf32>
    %cst_1 = arith.constant 1.250000e-01 : f32
    %3 = vector.broadcast %cst_1 : f32 to vector<1x128xf32>
    %4 = arith.mulf %2, %3 : vector<1x128xf32>
    %5 = vector.broadcast %4 : vector<1x128xf32> to vector<8x128xf32>
    %6 = arith.subf %0, %5 : vector<8x128xf32>
    %7 = arith.mulf %6, %6 : vector<8x128xf32>
    %cst_2 = arith.constant dense<0.000000e+00> : vector<128xf32>
    %8 = vector.multi_reduction <add>, %7, %cst_2 [0] : vector<8x128xf32> to vector<128xf32>
    %9 = vector.shape_cast %8 : vector<128xf32> to vector<1x128xf32>
    %cst_3 = arith.constant 0.142857149 : f32
    %10 = vector.broadcast %cst_3 : f32 to vector<1x128xf32>
    %11 = arith.mulf %9, %10 : vector<1x128xf32>
    %cst_4 = arith.constant 9.99999974E-6 : f32
    %12 = vector.broadcast %cst_4 : f32 to vector<1x128xf32>
    %13 = arith.addf %11, %12 : vector<1x128xf32>
    %14 = math.rsqrt %13 : vector<1x128xf32>
    %c0_5 = arith.constant 0 : index
    %c0_6 = arith.constant 0 : index
    %15 = vector.load %arg2[%c0_5, %c0_6] : memref<1x128xf32, #tpu.memory_space<vmem>>, vector<1x128xf32>
    %c0_7 = arith.constant 0 : index
    %c0_8 = arith.constant 0 : index
    %16 = vector.load %arg3[%c0_7, %c0_8] : memref<1x128xf32, #tpu.memory_space<vmem>>, vector<1x128xf32>
    %17 = math.exp %15 : vector<1x128xf32>
    %18 = arith.mulf %17, %14 : vector<1x128xf32>
    %19 = arith.mulf %18, %4 : vector<1x128xf32>
    %20 = arith.subf %16, %19 : vector<1x128xf32>
    %21 = vector.broadcast %18 : vector<1x128xf32> to vector<8x128xf32>
    %22 = arith.mulf %0, %21 : vector<8x128xf32>
    %23 = vector.broadcast %20 : vector<1x128xf32> to vector<8x128xf32>
    %24 = arith.addf %22, %23 : vector<8x128xf32>
    %c0_9 = arith.constant 0 : index
    %c0_10 = arith.constant 0 : index
    %25 = vector.load %arg4[%c0_9, %c0_10] : memref<8x128xf32, #tpu.memory_space<vmem>>, vector<8x128xf32>
    tpu.vector_store %arg4[%c0_9, %c0_10], %24 {strides = array<i32>} : memref<8x128xf32, #tpu.memory_space<vmem>>, vector<8x128xf32>,
    %c0_11 = arith.constant 0 : index
    %c0_12 = arith.constant 0 : index
    %26 = vector.load %arg5[%c0_11, %c0_12] : memref<2x128xf32, #tpu.memory_space<vmem>>, vector<1x128xf32>
    tpu.vector_store %arg5[%c0_11, %c0_12], %4 {strides = array<i32>} : memref<2x128xf32, #tpu.memory_space<vmem>>, vector<1x128xf32>,
    %c1 = arith.constant 1 : index
    %c0_13 = arith.constant 0 : index
    %27 = vector.load %arg5[%c1, %c0_13] : memref<2x128xf32, #tpu.memory_space<vmem>>, vector<1x128xf32>
    tpu.vector_store %arg5[%c1, %c0_13], %11 {strides = array<i32>} : memref<2x128xf32, #tpu.memory_space<vmem>>, vector<1x128xf32>,
    return
  }
  func.func @transform_0(%arg0: i32) -> (i32, i32) {
    %c0_i32 = arith.constant 0 : i32
    %c0_i32_0 = arith.constant 0 : i32
    return %c0_i32, %arg0 : i32, i32
  }
  func.func @transform_1(%arg0: i32) -> (i32, i32) {
    %c0_i32 = arith.constant 0 : i32
    %c0_i32_0 = arith.constant 0 : i32
    return %c0_i32, %arg0 : i32, i32
  }
  func.func @transform_2(%arg0: i32) -> (i32, i32) {
    %c0_i32 = arith.constant 0 : i32
    %c0_i32_0 = arith.constant 0 : i32
    return %c0_i32, %arg0 : i32, i32
  }
  func.func @transform_3(%arg0: i32) -> (i32, i32) {
    %c0_i32 = arith.constant 0 : i32
    %c0_i32_0 = arith.constant 0 : i32
    return %c0_i32, %arg0 : i32, i32
  }
  func.func @transform_4(%arg0: i32) -> (i32, i32) {
    %c0_i32 = arith.constant 0 : i32
    %c0_i32_0 = arith.constant 0 : i32
    return %c0_i32, %arg0 : i32, i32
  }
}

</mosaic_0001>

<bundles_post_ra>
// kernel: tpu_custom_call.1
= control target key start
LH: loop header
LB: loop body
LE: loop exit
PB: predicated region body
PF: predicated region fallthrough
CT: control target
= control target key end

     0   :  { %10 = vsyncpa [#allocation3], 0  ;;  %s251_s0 = inlined_call_operand.hbm [shape: f32[8,32], index: 0, kind: input, shape index: {}]   ;;  %s252_s1 = inlined_call_operand.vmem [shape: f32[1,128], index: 1, kind: input, shape index: {}]   ;;  %s253_s2 = inlined_call_operand.vmem [shape: f32[1,128], index: 2, kind: input, shape index: {}]   ;;  %s254_s3 = inlined_call_operand.hbm [shape: f32[8,32], index: 3, kind: output, shape index: {0}]   ;;  %s255_s4 = inlined_call_operand.hbm [shape: f32[2,32], index: 4, kind: output, shape index: {1}]  }
   0x1   :  { %11 = vsyncpa [#allocation4], 0 }
   0x2   :  { %12 = vsyncpa [#allocation7], 0  ;;  %s181_s15 = smov [#allocation2]   ;;  %s109_s19 = scalar_lea.hbm %s251_s0, 128 }
   0x3   :  { %s19_s16 = sshll.u32 %s181_s15, 4  ;;  %p110_p0 = scmp.ne.s32.totalorder %s251_s0, %s109_s19  ;;  %s20_s16 = int_to_ptr.vmem [resolvable:$true] %s19_s16 }
   0x4   :  { %p113_p1 = scmp.lt.u32.totalorder %s109_s19, %s251_s0 }
   0x6   :  { %p115_p2 = pnand %p113_p1, %p110_p0 }
   0x8   :  { %118 = shalt.err (!%p115_p2)
}
   0x9   :  { %s119_s24 = scalar_lea.vmem %s20_s16, 128  ;;  %p124_p4 = scmp.lt.s32.totalorder %s20_s16, %s20_s16 }
   0xa   :  { %p120_p3 = scmp.ne.s32.totalorder %s20_s16, %s119_s24  ;;  %p125_p5 = scmp.lt.s32.totalorder %s119_s24, %s119_s24 }
   0xc   :  { %p126_p6 = por %p125_p5, %p124_p4 }
   0xe   :  { %p127_p7 = pnand %p126_p6, %p120_p3 }
  0x10   :  { %130 = shalt.err (!%p127_p7)
}
  0x11   :  { %22 = dma.hbm_to_vmem [thread:$0]  %s251_s0, 128, %s20_s16, [#allocation3]  }
  0x12   :  { %175 = dma.done.wait [#allocation3], 128  }
  0x13   :  { %176 = vsyncadd [#allocation3], 4294967168  ;;  %v30_v0 = vld [vmem:[#allocation2] sm:$0xff]  ;;  %s182_s0 = smov [#allocation6]  }
  0x14   :  { %v31_v1 = vrot.slane %v30_v0, 4  ;;  %v49_v14 = vld [vmem:[%s252_s1] sm:$0x1]  ;;  %s89_s29 = sshll.u32 %s182_s0, 4  ;;  %s90_s29 = int_to_ptr.vmem [resolvable:$true] %s89_s29 }
  0x15   :  { %v51_v17 = vmul.f32 1.442695, %v49_v14  ;;  %s131_s30 = scalar_lea.vmem %s90_s29, 32  ;;  %p136_p9 = scmp.lt.s32.totalorder %s90_s29, %s90_s29 }
  0x16   :  { %v32_v2 = vadd.f32 %v31_v1, %v30_v0  ;;  %p132_p8 = scmp.ne.s32.totalorder %s90_s29, %s131_s30  ;;  %p137_p10 = scmp.lt.s32.totalorder %s131_s30, %s131_s30 }
  0x17   :  { %105 = vpow2.f32 %v51_v17 }
  0x18   :  { %v33_v3 = vrot.slane %v32_v2, 2  ;;  %p138_p11 = por %p137_p10, %p136_p9 }
  0x1a   :  { %v34_v4 = vadd.f32 %v33_v3, %v32_v2  ;;  %p139_p12 = pnand %p138_p11, %p132_p8 }
  0x1c   :  { %v35_v5 = vrot.slane %v34_v4, 1 }
  0x1e   :  { %v36_v6 = vadd.f32 %v35_v5, %v34_v4 }
  0x20   :  { %v37_v7 = vmul.f32 0.125, %v36_v6 }
  0x22   :  { %v38_v8 = vsub.f32 %v30_v0, %v37_v7  ;;  %71 = vst [vmem:[#allocation6] sm:$0x1] %v37_v7 }
  0x24   :  { %v39_v9 = vmul.f32 %v38_v8, %v38_v8 }
  0x26   :  { %v40_v10 = vrot.slane %v39_v9, 4 }
  0x28   :  { %v41_v11 = vadd.f32 %v40_v10, %v39_v9 }
  0x2a   :  { %v42_v12 = vrot.slane %v41_v11, 2 }
  0x2c   :  { %v43_v13 = vadd.f32 %v42_v12, %v41_v11 }
  0x2e   :  { %v44_v15 = vrot.slane %v43_v13, 1 }
  0x30   :  { %v45_v16 = vadd.f32 %v44_v15, %v43_v13 }
  0x32   :  { %v46_v18 = vmul.f32 0.14285715, %v45_v16 }
  0x34   :  { %v47_v19 = vadd.f32 1e-05, %v46_v18  ;;  %72 = vst [vmem:[#allocation6 + $0x1] sm:$0x1] %v46_v18 }
  0x35   :  { %142 = shalt.err (!%p139_p12)
}
  0x36   :  { %s143_s1 = scalar_lea.hbm %s255_s4, 32 }
  0x37   :  { %p144_p13 = scmp.ne.s32.totalorder %s255_s4, %s143_s1  ;;  %p147_p0 = scmp.lt.u32.totalorder %s143_s1, %s255_s4 }
  0x39   :  { %p149_p1 = pnand %p147_p0, %p144_p13 }
  0x3b   :  { %152 = shalt.err (!%p149_p1)
}
  0x3c   :  { %92 = dma.vmem_to_hbm [thread:$0]  %s90_s29, 32, %s255_s4, [#allocation7]   ;;  %107 = vrsqrt.f32 %v47_v19  ;;  %v57_v20 = vlaneseq  ;;  %v106_v22 = vpop.eup %105  ;;  %v50_v26 = vld [vmem:[%s253_s2] sm:$0x1] }
  0x3d   :  { %s183_s15 = smov [#allocation5]  }
  0x3e   :  { %v58_v21 = vshrl.u32 %v57_v20, 7  ;;  %s79_s16 = sshll.u32 %s183_s15, 4  ;;  %s80_s16 = int_to_ptr.vmem [resolvable:$true] %s79_s16 }
  0x3f   :  { %s153_s4 = scalar_lea.vmem %s80_s16, 128  ;;  %p158_p3 = scmp.lt.s32.totalorder %s80_s16, %s80_s16 }
  0x40   :  { %v59_v23 = vsub.s32 0, %v58_v21  ;;  %p154_p2 = scmp.ne.s32.totalorder %s80_s16, %s153_s4  ;;  %p159_p4 = scmp.lt.s32.totalorder %s153_s4, %s153_s4 }
  0x42   :  { %p160_p5 = por %p159_p4, %p158_p3 }
  0x44   :  { %p161_p6 = pnand %p160_p5, %p154_p2 }
  0x46   :  { %v108_v24 = vpop.eup %107 }
  0x47   :  { %v53_v25 = vmul.f32 %v108_v24, %v106_v22 }
  0x49   :  { %v54_v27 = vmul.f32 %v53_v25, %v37_v7  ;;  %v60_v28 = vrot.slane %v53_v25, %v59_v23 }
  0x4b   :  { %v55_v29 = vsub.f32 %v50_v26, %v54_v27  ;;  %v62_v30 = vmul.f32 %v60_v28, %v30_v0 }
  0x4d   :  { %v67_v31 = vrot.slane %v55_v29, %v59_v23 }
  0x4f   :  { %v69_v32 = vadd.f32 %v67_v31, %v62_v30 }
  0x51   :  { %70 = vst [vmem:[#allocation5] sm:$0xff] %v69_v32 }
  0x52   :  { %164 = shalt.err (!%p161_p6)
}
  0x53   :  { %s165_s2 = scalar_lea.hbm %s254_s3, 128 }
  0x54   :  { %p166_p7 = scmp.ne.s32.totalorder %s254_s3, %s165_s2  ;;  %p169_p8 = scmp.lt.u32.totalorder %s165_s2, %s254_s3 }
  0x56   :  { %p171_p9 = pnand %p169_p8, %p166_p7 }
  0x58   :  { %174 = shalt.err (!%p171_p9)
}
  0x59   :  { %82 = dma.vmem_to_hbm [thread:$0]  %s80_s16, 128, %s254_s3, [#allocation4]  }
  0x5a   :  { %177 = dma.done.wait [#allocation4], 128  }
  0x5b   :  { %178 = vsyncadd [#allocation4], 4294967168 }
  0x5c   :  { %179 = dma.done.wait [#allocation7], 32  }
  0x5d   :  { %180 = vsyncadd [#allocation7], 4294967264 }
  0x5e   :  { %99 = vsyncpa [#allocation3], 1 }
  0x5f   :  { %100 = vsyncpa [#allocation4], 1 }
  0x60   :  { %101 = vsyncpa [#allocation7], 1 }

</bundles_post_ra>
